<compile_context>
chip_gen: v7x
topology: tpu7x:2x2x1
jax: 0.10.0
libtpu: 0.0.40
codegen_flags: <defaults>
</compile_context>

<pallas_src>
import functools
import math

import numpy as np
import jax
import jax.numpy as jnp
from jax.experimental import pallas as pl
from jax.experimental.pallas import tpu as pltpu


# ----------------------------------------------------------------------------
# sincos positional embedding (numpy glue, same as reference)
# ----------------------------------------------------------------------------
def _get_1d_sincos_pos_embed_from_grid(embed_dim, pos):
    omega = np.arange(embed_dim // 2, dtype=np.float64)
    omega /= embed_dim / 2.0
    omega = 1.0 / 10000 ** omega
    pos = pos.reshape(-1)
    out = np.einsum("m,d->md", pos, omega)
    return np.concatenate([np.sin(out), np.cos(out)], axis=1)


def _get_2d_sincos_pos_embed_from_grid(embed_dim, grid):
    emb_h = _get_1d_sincos_pos_embed_from_grid(embed_dim // 2, grid[0])
    emb_w = _get_1d_sincos_pos_embed_from_grid(embed_dim // 2, grid[1])
    return np.concatenate([emb_h, emb_w], axis=1)


def get_2d_sincos_pos_embed(embed_dim, grid_size, shift=(0, 0)):
    grid_h = np.arange(shift[0], shift[0] + grid_size[0], dtype=np.float32)
    grid_w = np.arange(shift[1], shift[1] + grid_size[1], dtype=np.float32)
    grid = np.meshgrid(grid_w, grid_h)
    grid = np.stack(grid, axis=0).reshape([2, 1, grid_size[0], grid_size[1]])
    return _get_2d_sincos_pos_embed_from_grid(embed_dim, grid)


def _round_up(x, m):
    return ((x + m - 1) // m) * m


# ----------------------------------------------------------------------------
# Pallas kernels
# ----------------------------------------------------------------------------
def _layernorm(v, eps=1e-6):
    mu = jnp.mean(v, axis=-1, keepdims=True)
    var = jnp.mean((v - mu) ** 2, axis=-1, keepdims=True)
    return (v - mu) * jax.lax.rsqrt(var + eps)


def _linear_kernel(x_ref, w_ref, b_ref, o_ref):
    # bf16 operands on the MXU, f32 accumulation.
    y = jnp.dot(x_ref[...].astype(jnp.bfloat16), w_ref[...],
                preferred_element_type=jnp.float32) + b_ref[...].astype(jnp.float32)
    o_ref[...] = y.astype(o_ref.dtype)


def linear_pallas(x, w, b, block_rows=256):
    """y = x @ w + b (f32 out), row-tiled so the pipeline double-buffers and the
    'parallel' grid axis can be split across TensorCores."""
    B, K = x.shape
    Nout = w.shape[1]
    br = min(block_rows, _round_up(B, 8))
    Bp = _round_up(B, br)
    xp = jnp.pad(x, ((0, Bp - B), (0, 0))) if Bp != B else x
    out = pl.pallas_call(
        _linear_kernel,
        out_shape=jax.ShapeDtypeStruct((Bp, Nout), jnp.float32),
        grid=(Bp // br,),
        in_specs=[pl.BlockSpec((br, K), lambda i: (i, 0)),
                  pl.BlockSpec((K, Nout), lambda i: (0, 0)),
                  pl.BlockSpec((1, Nout), lambda i: (0, 0))],
        out_specs=pl.BlockSpec((br, Nout), lambda i: (i, 0)),
        compiler_params=pltpu.CompilerParams(
            dimension_semantics=("parallel",),
            vmem_limit_bytes=32 * 1024 * 1024),
    )(xp, w, b.reshape(1, Nout))
    return out[:B] if Bp != B else out


def _dit_block_kernel(x_ref, c_ref, ada_w_ref, ada_b_ref,
                      qkv_w_ref, qkv_b_ref, proj_w_ref, proj_b_ref,
                      fc1_w_ref, fc1_b_ref, fc2_w_ref, fc2_b_ref,
                      o_ref, *, num_heads):
    f32, bf16 = jnp.float32, jnp.bfloat16
    x = x_ref[0].astype(f32)          # (L, D)
    c = c_ref[0].astype(bf16)         # (1, D)  SiLU(t_emb) for this sample
    L, D = x.shape
    H = num_heads
    hd = D // H

    # ---- fused adaLN modulation: one (1,D)x(D,6D) MXU matmul (no extra launch) ----
    mod = (jnp.dot(c, ada_w_ref[...], preferred_element_type=f32)
           + ada_b_ref[...].astype(f32))                                  # (1, 6D)
    shift_msa, scale_msa, gate_msa = mod[:, 0:D], mod[:, D:2 * D], mod[:, 2 * D:3 * D]
    shift_mlp, scale_mlp, gate_mlp = mod[:, 3 * D:4 * D], mod[:, 4 * D:5 * D], mod[:, 5 * D:6 * D]

    # ---- attention branch (adaLN modulated) ----
    h = _layernorm(x) * (1.0 + scale_msa) + shift_msa                     # (L, D) f32
    qkv = (jnp.dot(h.astype(bf16), qkv_w_ref[...], preferred_element_type=f32)
           + qkv_b_ref[...].astype(f32))                                  # (L, 3D)

    # Head-batched attention: heads become the batch dim of single dot_generals
    # (replaces the per-head unrolled K=32 matmuls).
    q = jnp.stack([qkv[:, hi * hd:(hi + 1) * hd] for hi in range(H)], axis=0)            # (H,L,hd)
    k = jnp.stack([qkv[:, D + hi * hd:D + (hi + 1) * hd] for hi in range(H)], axis=0)    # (H,L,hd)
    v = jnp.stack([qkv[:, 2 * D + hi * hd:2 * D + (hi + 1) * hd] for hi in range(H)], axis=0)

    scale = 1.0 / math.sqrt(hd)
    s = jnp.einsum("hqd,hkd->hqk", q.astype(bf16), k.astype(bf16),
                   preferred_element_type=f32) * scale                    # (H, L, L)
    s = s - jnp.max(s, axis=-1, keepdims=True)
    p = jnp.exp(s)
    p = p * pl.reciprocal(jnp.sum(p, axis=-1, keepdims=True), approx=True)
    ctx = jnp.einsum("hqk,hkd->hqd", p.astype(bf16), v.astype(bf16),
                     preferred_element_type=f32)                          # (H, L, hd)
    ctx = jnp.concatenate([ctx[hi] for hi in range(H)], axis=-1)          # (L, D)

    attn = (jnp.dot(ctx.astype(bf16), proj_w_ref[...], preferred_element_type=f32)
            + proj_b_ref[...].astype(f32))
    x = x + gate_msa * attn

    # ---- MLP branch (adaLN modulated, tanh-GELU; elementwise stays f32) ----
    h2 = _layernorm(x) * (1.0 + scale_mlp) + shift_mlp
    mid = (jnp.dot(h2.astype(bf16), fc1_w_ref[...], preferred_element_type=f32)
           + fc1_b_ref[...].astype(f32))
    mid = jax.nn.gelu(mid, approximate=True)
    out = (jnp.dot(mid.astype(bf16), fc2_w_ref[...], preferred_element_type=f32)
           + fc2_b_ref[...].astype(f32))
    x = x + gate_mlp * out

    o_ref[0] = x.astype(o_ref.dtype)


def dit_block_pallas(x, c_silu, blk, num_heads):
    N, L, D = x.shape
    Dh = blk["fc1_w"].shape[1]
    kern = functools.partial(_dit_block_kernel, num_heads=num_heads)
    return pl.pallas_call(
        kern,
        out_shape=jax.ShapeDtypeStruct((N, L, D), jnp.float32),
        grid=(N,),
        in_specs=[
            pl.BlockSpec((1, L, D), lambda n: (n, 0, 0)),     # x (per sample)
            pl.BlockSpec((1, 1, D), lambda n: (n, 0, 0)),     # SiLU(t_emb)
            pl.BlockSpec((D, 6 * D), lambda n: (0, 0)),       # adaLN weight
            pl.BlockSpec((1, 6 * D), lambda n: (0, 0)),
            pl.BlockSpec((D, 3 * D), lambda n: (0, 0)),       # qkv
            pl.BlockSpec((1, 3 * D), lambda n: (0, 0)),
            pl.BlockSpec((D, D), lambda n: (0, 0)),           # attn proj
            pl.BlockSpec((1, D), lambda n: (0, 0)),
            pl.BlockSpec((D, Dh), lambda n: (0, 0)),          # mlp fc1
            pl.BlockSpec((1, Dh), lambda n: (0, 0)),
            pl.BlockSpec((Dh, D), lambda n: (0, 0)),          # mlp fc2
            pl.BlockSpec((1, D), lambda n: (0, 0)),
        ],
        out_specs=pl.BlockSpec((1, L, D), lambda n: (n, 0, 0)),
        compiler_params=pltpu.CompilerParams(
            dimension_semantics=("parallel",),
            vmem_limit_bytes=32 * 1024 * 1024),
    )(x, c_silu,
      blk["ada_w"], blk["ada_b"].reshape(1, -1),
      blk["qkv_w"], blk["qkv_b"].reshape(1, -1),
      blk["proj_w"], blk["proj_b"].reshape(1, -1),
      blk["fc1_w"], blk["fc1_b"].reshape(1, -1),
      blk["fc2_w"], blk["fc2_b"].reshape(1, -1))


def _final_layer_kernel(x_ref, c_ref, ada_w_ref, ada_b_ref, w_ref, b_ref, o_ref):
    f32, bf16 = jnp.float32, jnp.bfloat16
    x = x_ref[0].astype(f32)          # (L, D)
    c = c_ref[0].astype(bf16)         # (1, D)
    D = x.shape[1]
    mod = (jnp.dot(c, ada_w_ref[...], preferred_element_type=f32)
           + ada_b_ref[...].astype(f32))                                  # (1, 2D)
    shift, scale = mod[:, 0:D], mod[:, D:2 * D]
    h = _layernorm(x) * (1.0 + scale) + shift
    y = (jnp.dot(h.astype(bf16), w_ref[...], preferred_element_type=f32)
         + b_ref[...].astype(f32))
    o_ref[0] = y.astype(o_ref.dtype)


def final_layer_pallas(x, c_silu, ada_w, ada_b, w, b):
    N, L, D = x.shape
    P = w.shape[1]
    return pl.pallas_call(
        _final_layer_kernel,
        out_shape=jax.ShapeDtypeStruct((N, L, P), jnp.float32),
        grid=(N,),
        in_specs=[pl.BlockSpec((1, L, D), lambda n: (n, 0, 0)),
                  pl.BlockSpec((1, 1, D), lambda n: (n, 0, 0)),
                  pl.BlockSpec((D, 2 * D), lambda n: (0, 0)),
                  pl.BlockSpec((1, 2 * D), lambda n: (0, 0)),
                  pl.BlockSpec((D, P), lambda n: (0, 0)),
                  pl.BlockSpec((1, P), lambda n: (0, 0))],
        out_specs=pl.BlockSpec((1, L, P), lambda n: (n, 0, 0)),
        compiler_params=pltpu.CompilerParams(
            dimension_semantics=("parallel",),
            vmem_limit_bytes=32 * 1024 * 1024),
    )(x, c_silu, ada_w, ada_b.reshape(1, -1), w, b.reshape(1, -1))


# ----------------------------------------------------------------------------
# Parameter construction (deterministic; matmul weights stored in bf16)
# ----------------------------------------------------------------------------
def init_params(key, cfg):
    D = cfg["hidden_size"]
    C = cfg["in_channels"]
    p1, p2 = cfg["patch_size"]
    Co = cfg["out_channels"]
    depth = cfg["depth"]
    mlp_hidden = int(D * cfg["mlp_ratio"])
    freq = 256
    bf16 = jnp.bfloat16

    def xavier(k, shape):
        std = math.sqrt(2.0 / (shape[0] + shape[1]))
        return (jax.random.normal(k, shape, jnp.float32) * std).astype(bf16)

    keys = iter(jax.random.split(key, 64))
    params = {
        "patch_w": xavier(next(keys), (C * p1 * p2, D)),
        "patch_b": jnp.zeros((D,), jnp.float32),
        # timestep-embedder MLP is tiny and runs in plain XLA -> keep f32
        "t_w1": jax.random.normal(next(keys), (freq, D), jnp.float32) * 0.02,
        "t_b1": jnp.zeros((D,), jnp.float32),
        "t_w2": jax.random.normal(next(keys), (D, D), jnp.float32) * 0.02,
        "t_b2": jnp.zeros((D,), jnp.float32),
    }
    blocks = []
    for _ in range(depth):
        blocks.append(dict(
            qkv_w=xavier(next(keys), (D, 3 * D)),
            qkv_b=jnp.zeros((3 * D,), jnp.float32),
            proj_w=xavier(next(keys), (D, D)),
            proj_b=jnp.zeros((D,), jnp.float32),
            fc1_w=xavier(next(keys), (D, mlp_hidden)),
            fc1_b=jnp.zeros((mlp_hidden,), jnp.float32),
            fc2_w=xavier(next(keys), (mlp_hidden, D)),
            fc2_b=jnp.zeros((D,), jnp.float32),
            ada_w=(jax.random.normal(next(keys), (D, 6 * D), jnp.float32) * 0.02).astype(bf16),
            ada_b=jnp.zeros((6 * D,), jnp.float32),
        ))
    params["blocks"] = blocks
    params["final_ada_w"] = (jax.random.normal(next(keys), (D, 2 * D), jnp.float32) * 0.02).astype(bf16)
    params["final_ada_b"] = jnp.zeros((2 * D,), jnp.float32)
    params["final_w"] = (jax.random.normal(next(keys), (D, p1 * p2 * Co), jnp.float32) * 0.02).astype(bf16)
    params["final_b"] = jnp.zeros((p1 * p2 * Co,), jnp.float32)
    return params


# ----------------------------------------------------------------------------
# Forward pass (glue in plain JAX/numpy; hot paths in Pallas)
# ----------------------------------------------------------------------------
def timestep_embedding(t, dim, max_period=10000):
    half = dim // 2
    freqs = jnp.exp(-math.log(max_period) * jnp.arange(half, dtype=jnp.float32) / half)
    args = t.astype(jnp.float32)[:, None] * freqs[None]
    return jnp.concatenate([jnp.cos(args), jnp.sin(args)], axis=-1)


def diti_forward(params, x, t, cfg, pos=(0, 0)):
    N, MH, MW, C, H, W = x.shape
    M = MH * MW
    p1, p2 = cfg["patch_size"]
    D = cfg["hidden_size"]
    Co = cfg["out_channels"]
    s1, s2 = cfg["stride"]
    gh, gw = H // p1, W // p2
    T = gh * gw

    # --- PatchEmbed: strided conv == patchify (glue) + row-tiled Pallas matmul ---
    xp = x.reshape(N * M, C, gh, p1, gw, p2)
    xp = jnp.transpose(xp, (0, 2, 4, 1, 3, 5)).reshape(N * M * T, C * p1 * p2)
    xe = linear_pallas(xp, params["patch_w"], params["patch_b"]).reshape(N, M, T, D)

    if cfg["add_pos_emb"]:
        embeds = []
        for i in range(MH):
            for j in range(MW):
                embeds.append(get_2d_sincos_pos_embed(
                    D, (gh, gw),
                    shift=(i * cfg["base_size"][0] + pos[0],
                           j * cfg["base_size"][1] + pos[1])))
        pos_embed = jnp.asarray(np.stack(embeds, axis=0), jnp.float32)   # (M, T, D)
        xe = xe + pos_embed[None]

    # TODO(synk): get_idx_h_w / RotaryAttention are not defined in the reference;
    #             only the use_rotary_attn=False (standard Attention) path is implemented.

    x_seq = xe.reshape(N, M * T, D)

    # --- Timestep embedder: sinusoidal + MLP (tiny; plain XLA, no kernel launches) ---
    t_freq = timestep_embedding(t, 256)
    th = jax.nn.silu(t_freq @ params["t_w1"] + params["t_b1"])
    c = th @ params["t_w2"] + params["t_b2"]                             # (N, D)
    c_silu = jax.nn.silu(c).reshape(N, 1, D)   # shared SiLU input of every adaLN modulation

    # --- DiT blocks: one fused Pallas kernel per block (adaLN + attn + MLP) ---
    for blk in params["blocks"]:
        x_seq = dit_block_pallas(x_seq, c_silu, blk, cfg["num_heads"])

    # --- Final layer (fused adaLN + modulated LayerNorm + linear) ---
    P = p1 * p2 * Co
    xf = final_layer_pallas(x_seq, c_silu, params["final_ada_w"], params["final_ada_b"],
                            params["final_w"], params["final_b"])
    xf = xf.reshape(N, M, T, P)

    # --- unpatchify: (N, M, T, p1*p2*C) -> (N, M, C, H, W) ---
    xi = xf.reshape(N, M, gh, gw, p1, p2, Co)
    xi = jnp.transpose(xi, (0, 1, 6, 2, 4, 3, 5)).reshape(N, M, Co, gh * p1, gw * p2)

    # --- overlap-add averaging over the MH x MW tiles (static reciprocal coverage) ---
    H_out = s1 * (MH - 1) + H
    W_out = s2 * (MW - 1) + W
    res = jnp.zeros((N, Co, H_out, W_out), jnp.float32)
    cover = np.zeros((H_out, W_out), np.float32)
    ptr = 0
    for i in range(MH):
        for j in range(MW):
            L1, L2 = i * s1, j * s2
            res = res.at[:, :, L1:L1 + H, L2:L2 + W].add(xi[:, ptr])
            cover[L1:L1 + H, L2:L2 + W] += 1.0
            ptr += 1
    inv_cover = jnp.asarray(1.0 / cover, jnp.float32)
    return res * inv_cover[None, None]


# ----------------------------------------------------------------------------
if __name__ == "__main__":
    cfg = dict(
        base_size=(16, 16), patch_size=(8, 8), in_channels=4, hidden_size=128,
        depth=2, num_heads=4, mlp_ratio=4.0, out_channels=4, stride=(8, 8),
        add_pos_emb=True, use_rotary_attn=False,
    )
    key = jax.random.PRNGKey(0)
    kp, kx = jax.random.split(key, 2)
    params = init_params(kp, cfg)

    N, MH, MW = 2, 2, 2
    x = jax.random.normal(
        kx, (N, MH, MW, cfg["in_channels"], cfg["base_size"][0], cfg["base_size"][1]),
        jnp.float32)
    t = jnp.array([3.0, 7.0], jnp.float32)

    out = diti_forward(params, x, t, cfg)
    jax.block_until_ready(out)

    H_out = cfg["stride"][0] * (MH - 1) + cfg["base_size"][0]
    W_out = cfg["stride"][1] * (MW - 1) + cfg["base_size"][1]
    assert out.shape == (N, cfg["out_channels"], H_out, W_out)
    assert bool(jnp.all(jnp.isfinite(out)))
    print("KERNEL_OK")
</pallas_src>

<mosaic_0001>
module attributes {stable_mosaic.version = 11 : i64} {
  func.func @_linear_kernel(%arg0: i32, %arg1: memref<32x256xf32, #tpu.memory_space<vmem>>, %arg2: memref<256x128xbf16, #tpu.memory_space<vmem>>, %arg3: memref<1x128xf32, #tpu.memory_space<vmem>>, %arg4: memref<32x128xf32, #tpu.memory_space<vmem>>) attributes {dimension_semantics = [#tpu.dimension_semantics<parallel>], iteration_bounds = array<i64: 1>, scalar_prefetch = 0 : i64, scratch_operands = 0 : i64, tpu.core_type = #tpu.core_type<tc>, window_params = [{transform_indices = @transform_0, window_bounds = array<i64: 32, 256>}, {pipeline_mode = #tpu.pipeline_mode<synchronous>, transform_indices = @transform_1, window_bounds = array<i64: 256, 128>}, {pipeline_mode = #tpu.pipeline_mode<synchronous>, transform_indices = @transform_2, window_bounds = array<i64: 1, 128>}, {transform_indices = @transform_3, window_bounds = array<i64: 32, 128>}]} {
    %c0 = arith.constant 0 : index
    %c0_0 = arith.constant 0 : index
    %0 = vector.load %arg1[%c0, %c0_0] : memref<32x256xf32, #tpu.memory_space<vmem>>, vector<32x256xf32>
    %1 = arith.truncf %0 : vector<32x256xf32> to vector<32x256xbf16>
    %c0_1 = arith.constant 0 : index
    %c0_2 = arith.constant 0 : index
    %2 = vector.load %arg2[%c0_1, %c0_2] : memref<256x128xbf16, #tpu.memory_space<vmem>>, vector<256x128xbf16>
    %cst = arith.constant dense<0.000000e+00> : vector<32x128xf32>
    %3 = tpu.matmul %1, %2, %cst {dimension_numbers = #tpu.dot_dimension_numbers<[1], [0], [0], [1], [0, 0, 1, 1], [], []>} : vector<32x256xbf16>, vector<256x128xbf16>, vector<32x128xf32> -> vector<32x128xf32>
    %c0_3 = arith.constant 0 : index
    %c0_4 = arith.constant 0 : index
    %4 = vector.load %arg3[%c0_3, %c0_4] : memref<1x128xf32, #tpu.memory_space<vmem>>, vector<1x128xf32>
    %5 = vector.broadcast %4 : vector<1x128xf32> to vector<32x128xf32>
    %6 = arith.addf %3, %5 : vector<32x128xf32>
    %c0_5 = arith.constant 0 : index
    %c0_6 = arith.constant 0 : index
    %7 = vector.load %arg4[%c0_5, %c0_6] : memref<32x128xf32, #tpu.memory_space<vmem>>, vector<32x128xf32>
    tpu.vector_store %arg4[%c0_5, %c0_6], %6 {strides = array<i32>} : memref<32x128xf32, #tpu.memory_space<vmem>>, vector<32x128xf32>,
    return
  }
  func.func @transform_0(%arg0: i32) -> (i32, i32) {
    %c0_i32 = arith.constant 0 : i32
    %c0_i32_0 = arith.constant 0 : i32
    return %arg0, %c0_i32 : i32, i32
  }
  func.func @transform_1(%arg0: i32) -> (i32, i32) {
    %c0_i32 = arith.constant 0 : i32
    %c0_i32_0 = arith.constant 0 : i32
    %c0_i32_1 = arith.constant 0 : i32
    return %c0_i32, %c0_i32_0 : i32, i32
  }
  func.func @transform_2(%arg0: i32) -> (i32, i32) {
    %c0_i32 = arith.constant 0 : i32
    %c0_i32_0 = arith.constant 0 : i32
    %c0_i32_1 = arith.constant 0 : i32
    return %c0_i32, %c0_i32_0 : i32, i32
  }
  func.func @transform_3(%arg0: i32) -> (i32, i32) {
    %c0_i32 = arith.constant 0 : i32
    %c0_i32_0 = arith.constant 0 : i32
    return %arg0, %c0_i32 : i32, i32
  }
}

</mosaic_0001>

<bundles_post_ra>
// kernel: tpu_custom_call.1
= control target key start
LH: loop header
LB: loop body
LE: loop exit
PB: predicated region body
PF: predicated region fallthrough
CT: control target
= control target key end

     0   :  { %8 = vsyncpa [#allocation3], 0  ;;  %s488_s0 = inlined_call_operand.hbm [shape: f32[32,256], index: 0, kind: input, shape index: {}]   ;;  %s489_s1 = inlined_call_operand.hbm [shape: bf16[256,128], index: 1, kind: input, shape index: {}]   ;;  %s490_s2 = inlined_call_operand.vmem [shape: f32[1,128], index: 2, kind: input, shape index: {}]   ;;  %s491_s3 = inlined_call_operand.hbm [shape: f32[32,128], index: 3, kind: output, shape index: {}]  }
   0x1   :  { %9 = vsyncpa [#allocation6], 0 }
   0x2   :  { %10 = vsyncpa [#allocation4], 0  ;;  %s420_s12 = smov [#allocation2]   ;;  %s348_s16 = scalar_lea.hbm %s488_s0, 1024 }
   0x3   :  { %s16_s13 = sshll.u32 %s420_s12, 4  ;;  %p349_p0 = scmp.ne.s32.totalorder %s488_s0, %s348_s16  ;;  %s17_s13 = int_to_ptr.vmem [resolvable:$true] %s16_s13 }
   0x4   :  { %p352_p1 = scmp.lt.u32.totalorder %s348_s16, %s488_s0 }
   0x6   :  { %p354_p2 = pnand %p352_p1, %p349_p0 }
   0x8   :  { %357 = shalt.err (!%p354_p2)
}
   0x9   :  { %s358_s21 = scalar_lea.vmem %s17_s13, 1024  ;;  %p363_p4 = scmp.lt.s32.totalorder %s17_s13, %s17_s13 }
   0xa   :  { %p359_p3 = scmp.ne.s32.totalorder %s17_s13, %s358_s21  ;;  %p364_p5 = scmp.lt.s32.totalorder %s358_s21, %s358_s21 }
   0xc   :  { %p365_p6 = por %p364_p5, %p363_p4 }
   0xe   :  { %p366_p7 = pnand %p365_p6, %p359_p3 }
  0x10   :  { %369 = shalt.err (!%p366_p7)
}
  0x11   :  { %s421_s22 = smov 256   ;;  %s422_s23 = smov 16  }
  0x12   :  { %22 = dma.hbm_to_vmem [thread:$0]  %s488_s0, 1024, %s17_s13, [#allocation3], %s421_s22, %s421_s22, %s422_s23  }
  0x13   :  { %s423_s26 = smov [#allocation5]   ;;  %s370_s30 = scalar_lea.hbm %s489_s1, 2048 }
  0x14   :  { %s28_s27 = sshll.u32 %s423_s26, 4  ;;  %p371_p8 = scmp.ne.s32.totalorder %s489_s1, %s370_s30  ;;  %s29_s27 = int_to_ptr.vmem [resolvable:$true] %s28_s27 }
  0x15   :  { %p374_p9 = scmp.lt.u32.totalorder %s370_s30, %s489_s1 }
  0x17   :  { %p376_p10 = pnand %p374_p9, %p371_p8 }
  0x19   :  { %379 = shalt.err (!%p376_p10)
}
  0x1a   :  { %s380_s8 = scalar_lea.vmem %s29_s27, 2048  ;;  %p385_p12 = scmp.lt.s32.totalorder %s29_s27, %s29_s27 }
  0x1b   :  { %p381_p11 = scmp.ne.s32.totalorder %s29_s27, %s380_s8  ;;  %p386_p13 = scmp.lt.s32.totalorder %s380_s8, %s380_s8 }
  0x1d   :  { %p387_p0 = por %p386_p13, %p385_p12 }
  0x1f   :  { %p388_p1 = pnand %p387_p0, %p381_p11 }
  0x21   :  { %391 = shalt.err (!%p388_p1)
}
  0x22   :  { %s424_s0 = smov 64   ;;  %s425_s9 = smov 4  }
  0x23   :  { %34 = dma.hbm_to_vmem [thread:$0]  %s489_s1, 2048, %s29_s27, [#allocation6], %s424_s0, %s424_s0, %s425_s9  }
  0x24   :  { %414 = dma.done.wait [#allocation3], 1024  }
  0x25   :  { %415 = vsyncadd [#allocation3], 4294966272 }
  0x26   :  { %416 = dma.done.wait [#allocation6], 2048  }
  0x27   :  { %417 = vsyncadd [#allocation6], 4294965248  ;;  %v332_v0 = vld [vmem:[#allocation5 + $0x40] sm:$0xff]   ;;  %v334_v2 = vld [vmem:[#allocation5 + $0x48] sm:$0xff]   ;;  %s426_s13 = smov [#allocation7]  }
  0x28   :  { %v333_v1 = vld [vmem:[#allocation5] sm:$0xff]   ;;  %279 = vmatprep.subr.bf16.mxu0 %v332_v0  ;;  %307 = vmatprep.subr.bf16.mxu1 %v332_v0  ;;  %v335_v3 = vld [vmem:[#allocation5 + $0x8] sm:$0xff]   ;;  %v336_v4 = vld [vmem:[#allocation5 + $0x50] sm:$0xff]   ;;  %s249_s14 = sshll.u32 %s426_s13, 4  ;;  %s250_s14 = int_to_ptr.vmem [resolvable:$true] %s249_s14 }
  0x29   :  { %280 = vmatpush3.bf16.msra.mxu0 %v333_v1  ;;  %315 = vmatpush3.bf16.msra.mxu1 %v333_v1  ;;  %v337_v5 = vld [vmem:[#allocation5 + $0x10] sm:$0xff]   ;;  %v338_v6 = vld [vmem:[#allocation5 + $0x58] sm:$0xff]   ;;  %v340_v8 = vld [vmem:[#allocation5 + $0x60] sm:$0xff]   ;;  %p397_p3 = scmp.lt.s32.totalorder %s250_s14, %s250_s14 }
  0x2a   :  { %281 = vmatprep.subr.bf16.mxu0 %v334_v2  ;;  %308 = vmatprep.subr.bf16.mxu1 %v334_v2  ;;  %v339_v7 = vld [vmem:[#allocation5 + $0x18] sm:$0xff]   ;;  %v341_v9 = vld [vmem:[#allocation5 + $0x20] sm:$0xff]   ;;  %v342_v10 = vld [vmem:[#allocation5 + $0x68] sm:$0xff]  }
  0x2b   :  { %v45_v11 = vld [vmem:[#allocation2 + $0x8] sm:$0xff]  ;;  %v47_v12 = vld [vmem:[#allocation2 + $0x18] sm:$0xff]  ;;  %v344_v18 = vld [vmem:[#allocation5 + $0x70] sm:$0xff]  }
  0x2c   :  { %v49_v13 = vld [vmem:[#allocation2 + $0x28] sm:$0xff]  ;;  %v53_v14 = vpack.c.bf16 %v47_v12, %v45_v11  ;;  %v51_v15 = vld [vmem:[#allocation2 + $0x38] sm:$0xff]  ;;  %v345_v19 = vld [vmem:[#allocation5 + $0x30] sm:$0xff]  }
  0x2d   :  { %282 = vmatpush3.bf16.msra.mxu0 %v335_v3  ;;  %316 = vmatpush3.bf16.msra.mxu1 %v335_v3  ;;  %v55_v16 = vpack.c.bf16 %v51_v15, %v49_v13  ;;  %v343_v17 = vld [vmem:[#allocation5 + $0x28] sm:$0xff]   ;;  %v346_v20 = vld [vmem:[#allocation5 + $0x78] sm:$0xff]   ;;  %v44_v22 = vld [vmem:[#allocation2] sm:$0xff] }
  0x2e   :  { %283 = vmatprep.subr.bf16.mxu0 %v336_v4  ;;  %309 = vmatprep.subr.bf16.mxu1 %v336_v4  ;;  %v347_v21 = vld [vmem:[#allocation5 + $0x38] sm:$0xff]   ;;  %v46_v23 = vld [vmem:[#allocation2 + $0x10] sm:$0xff]  ;;  %v48_v24 = vld [vmem:[#allocation2 + $0x20] sm:$0xff] }
  0x2f   :  { %223 = vmatprep.mubr.bf16.mxu0 %v53_v14  ;;  %231 = vmatprep.mubr.bf16.mxu1 %v55_v16  ;;  %v50_v25 = vld [vmem:[#allocation2 + $0x30] sm:$0xff]  ;;  %v52_v26 = vpack.c.bf16 %v46_v23, %v44_v22  ;;  %v262_v30 = vld [vmem:[%s490_s2] ss:$0 sm:$0xff]  ;;  %s392_s2 = scalar_lea.vmem %s250_s14, 512 }
  0x30   :  { %v54_v27 = vpack.c.bf16 %v50_v25, %v48_v24  ;;  %p393_p2 = scmp.ne.s32.totalorder %s250_s14, %s392_s2  ;;  %p398_p4 = scmp.lt.s32.totalorder %s392_s2, %s392_s2 }
  0x31   :  { %284 = vmatpush3.bf16.msra.mxu0 %v337_v5  ;;  %317 = vmatpush3.bf16.msra.mxu1 %v337_v5 }
  0x32   :  { %285 = vmatprep.subr.bf16.mxu0 %v338_v6  ;;  %310 = vmatprep.subr.bf16.mxu1 %v338_v6  ;;  %p399_p5 = por %p398_p4, %p397_p3 }
  0x34   :  { %p400_p6 = pnand %p399_p5, %p393_p2 }
  0x35   :  { %286 = vmatpush3.bf16.msra.mxu0 %v339_v7  ;;  %318 = vmatpush3.bf16.msra.mxu1 %v339_v7 }
  0x36   :  { %287 = vmatprep.subr.bf16.mxu0 %v340_v8  ;;  %311 = vmatprep.subr.bf16.mxu1 %v340_v8 }
  0x39   :  { %288 = vmatpush3.bf16.msra.mxu0 %v341_v9  ;;  %319 = vmatpush3.bf16.msra.mxu1 %v341_v9 }
  0x3a   :  { %289 = vmatprep.subr.bf16.mxu0 %v342_v10  ;;  %312 = vmatprep.subr.bf16.mxu1 %v342_v10 }
  0x3d   :  { %290 = vmatpush3.bf16.msra.mxu0 %v343_v17  ;;  %320 = vmatpush3.bf16.msra.mxu1 %v343_v17 }
  0x3e   :  { %291 = vmatprep.subr.bf16.mxu0 %v344_v18  ;;  %313 = vmatprep.subr.bf16.mxu1 %v344_v18 }
  0x41   :  { %292 = vmatpush3.bf16.msra.mxu0 %v345_v19  ;;  %321 = vmatpush3.bf16.msra.mxu1 %v345_v19 }
  0x42   :  { %293 = vmatprep.subr.bf16.mxu0 %v346_v20  ;;  %314 = vmatprep.subr.bf16.mxu1 %v346_v20 }
  0x45   :  { %294 = vmatpush3.bf16.msra.mxu0 %v347_v21  ;;  %322 = vmatpush3.bf16.msra.mxu1 %v347_v21 }
  0x48   :  { %224 = vmatmul.mubr.bf16.vlgmr.msra.gmra.mrb[0].mxu0 %v52_v26  ;;  %232 = vmatmul.mubr.bf16.vlgmr.msra.gmra.mrb[0].mxu1 %v54_v27 }
 0x11b   :  { %v295_v28 = vpop.f32.mrb[0].mxu0  ;;  %v301_v29 = vpop.f32.mrb[0].mxu1 }
 0x11c   :  { %v296_v31 = vpop.f32.mrb[1].mxu0  ;;  %v302_v32 = vpop.f32.mrb[1].mxu1 }
 0x11d   :  { %v297_v33 = vadd.f32 %v296_v31, %v295_v28  ;;  %v303_v34 = vadd.f32 %v302_v32, %v301_v29  ;;  %v298_v35 = vpop.f32.mrb[2].mxu0  ;;  %v304_v36 = vpop.f32.mrb[2].mxu1 }
 0x11e   :  { %v299_v37 = vpop.f32.mrb[3].mxu0  ;;  %v305_v38 = vpop.f32.mrb[3].mxu1 }
 0x11f   :  { %v226_v39 = vadd.f32 %v297_v33, %v262_v30  ;;  %v234_v40 = vadd.f32 %v303_v34, %v262_v30  ;;  %v300_v41 = vadd.f32 %v299_v37, %v298_v35  ;;  %v306_v42 = vadd.f32 %v305_v38, %v304_v36 }
 0x121   :  { %240 = vst [vmem:[#allocation7] sm:$0xff] %v226_v39  ;;  %242 = vst [vmem:[#allocation7 + $0x10] sm:$0xff] %v234_v40  ;;  %v229_v43 = vadd.f32 %v300_v41, %v262_v30  ;;  %v237_v44 = vadd.f32 %v306_v42, %v262_v30 }
 0x123   :  { %241 = vst [vmem:[#allocation7 + $0x8] sm:$0xff] %v229_v43  ;;  %243 = vst [vmem:[#allocation7 + $0x18] sm:$0xff] %v237_v44 }
 0x124   :  { %403 = shalt.err (!%p400_p6)
}
 0x125   :  { %s404_s17 = scalar_lea.hbm %s491_s3, 512 }
 0x126   :  { %p405_p7 = scmp.ne.s32.totalorder %s491_s3, %s404_s17  ;;  %p408_p8 = scmp.lt.u32.totalorder %s404_s17, %s491_s3 }
 0x128   :  { %p410_p9 = pnand %p408_p8, %p405_p7 }
 0x12a   :  { %413 = shalt.err (!%p410_p9)
}
 0x12b   :  { %s427_s22 = smov 128   ;;  %s428_s23 = smov 8  }
 0x12c   :  { %255 = dma.vmem_to_hbm [thread:$0]  %s250_s14, 512, %s491_s3, [#allocation4], %s427_s22, %s427_s22, %s428_s23  }
 0x12d   :  { %418 = dma.done.wait [#allocation4], 512  }
 0x12e   :  { %419 = vsyncadd [#allocation4], 4294966784 }
 0x12f   :  { %259 = vsyncpa [#allocation3], 1 }
 0x130   :  { %260 = vsyncpa [#allocation6], 1 }
 0x131   :  { %261 = vsyncpa [#allocation4], 1 }

</bundles_post_ra>
